<compile_context>
chip_gen: v6e
topology: v6e:2x2x1
jax: 0.10.0
libtpu: 0.0.40
codegen_flags: <defaults>
</compile_context>

<pallas_src>
import jax
import jax.numpy as jnp
from jax.experimental import pallas as pl
from jax.experimental.pallas import tpu as pltpu


def gated_conv_kernel(x_ref, s1_ref, t1_ref, w1_ref, b1_ref, w2_ref, scal_ref,
                      o_ref):
    # x_ref: (C, tm) channels-first pixel tile (bf16 in HBM/VMEM); upcast once so
    # all VPU/EUP math is f32 (v5e has no bf16 VPU/EUP path).
    x = x_ref[...].astype(jnp.float32)

    # BatchNorm2d(C), eval mode: per-channel affine, broadcast along the lane axis.
    h = x * s1_ref[...] + t1_ref[...]                         # (C, tm)

    # Conv2d(C, C, kernel_size=1): channel mix == (C, C) @ (C, tm) matmul (MXU).
    h = jnp.dot(w1_ref[...], h, preferred_element_type=jnp.float32) + b1_ref[...]
    h = jnp.maximum(h, 0.0)                                   # ReLU

    # Conv2d(C, 1, kernel_size=1): VPU multiply + sublane reduce -> lane-dense (1, tm).
    g = jnp.sum(w2_ref[...] * h, axis=0, keepdims=True) + scal_ref[0]

    # BatchNorm2d(1), eval mode (scalar affine from SMEM) + Sigmoid (EUP recip).
    g = g * scal_ref[1] + scal_ref[2]
    sig = pl.reciprocal(1.0 + jnp.exp(-g), approx=True)
    o_ref[...] = sig.astype(o_ref.dtype)


def gated_conv(x_nchw, params, *, tm=1024):
    N, C, H, W = x_nchw.shape
    HW = H * W
    s1, t1, w1, b1, w2, scal = params

    # bf16 for the dominant HBM stream (x); NCHW -> (N, C, HW) reshape is free.
    x3 = x_nchw.astype(jnp.bfloat16).reshape(N, C, HW)

    # Pixel-axis tile: multiple of 128 (lane-dense stores), capped so the
    # double-buffered tiles fit comfortably inside v7x's 64 MiB VMEM.
    per_px_bytes = 2 * 2 * (C * 2 + 4)          # 2 pipeline bufs x (bf16 x-col + f32 out)
    tm_cap = max(128, (48 * 1024 * 1024 // per_px_bytes) // 128 * 128)
    tm = max(128, min(tm, tm_cap, pl.cdiv(HW, 128) * 128))

    # Pad the pixel axis to a multiple of tm (never fall back to one giant tile).
    HW_pad = pl.cdiv(HW, tm) * tm
    if HW_pad != HW:
        x3 = jnp.pad(x3, ((0, 0), (0, 0), (0, HW_pad - HW)))

    grid = (N, HW_pad // tm)

    # Explicit VMEM limit with headroom, kept below v7x's 64 MiB physical VMEM.
    tile_bytes = 2 * (C * tm * 2 + tm * 4)
    param_bytes = (C * C + 4 * C) * 4 + 64
    vmem_limit = int(min(56 * 1024 * 1024,
                         max(32 * 1024 * 1024, 4 * (tile_bytes + param_bytes))))

    out = pl.pallas_call(
        gated_conv_kernel,
        out_shape=jax.ShapeDtypeStruct((N, 1, HW_pad), jnp.float32),
        grid=grid,
        in_specs=[
            pl.BlockSpec((None, C, tm), lambda n, j: (n, 0, j)),  # x tile -> (C, tm)
            pl.BlockSpec((C, 1), lambda n, j: (0, 0)),            # BN1 scale
            pl.BlockSpec((C, 1), lambda n, j: (0, 0)),            # BN1 shift
            pl.BlockSpec((C, C), lambda n, j: (0, 0)),            # conv1 weight (out,in)
            pl.BlockSpec((C, 1), lambda n, j: (0, 0)),            # conv1 bias
            pl.BlockSpec((C, 1), lambda n, j: (0, 0)),            # conv2 weight (in,1)
            pl.BlockSpec(memory_space=pltpu.MemorySpace.SMEM),    # [b2, s2, t2] scalars
        ],
        out_specs=pl.BlockSpec((None, 1, tm), lambda n, j: (n, 0, j)),
        compiler_params=pltpu.CompilerParams(
            dimension_semantics=("parallel", "parallel"),
            vmem_limit_bytes=vmem_limit),
    )(x3, s1, t1, w1, b1, w2, scal)

    if HW_pad != HW:
        out = out[:, :, :HW]
    return out.reshape(N, 1, H, W)


def make_params(key, C, eps=1e-5):
    ks = jax.random.split(key, 10)
    # BatchNorm2d(C) parameters + running stats (deterministic, synthetic)
    gamma1 = jax.random.normal(ks[0], (C,), jnp.float32) * 0.1 + 1.0
    beta1 = jax.random.normal(ks[1], (C,), jnp.float32) * 0.1
    rmean1 = jax.random.normal(ks[2], (C,), jnp.float32) * 0.1
    rvar1 = jax.random.uniform(ks[3], (C,), jnp.float32, 0.5, 1.5)
    # Conv2d(C, C, 1): weight (out, in), bias (out,)
    w1 = jax.random.normal(ks[4], (C, C), jnp.float32) * (1.0 / jnp.sqrt(C))
    b1 = jax.random.normal(ks[5], (C,), jnp.float32) * 0.1
    # Conv2d(C, 1, 1)
    w2 = jax.random.normal(ks[6], (1, C), jnp.float32) * (1.0 / jnp.sqrt(C))
    b2 = jax.random.normal(ks[7], (1,), jnp.float32) * 0.1
    # BatchNorm2d(1)
    gamma2 = jax.random.normal(ks[8], (1,), jnp.float32) * 0.1 + 1.0
    beta2 = jax.random.normal(ks[9], (1,), jnp.float32) * 0.1
    rmean2 = jnp.zeros((1,), jnp.float32)
    rvar2 = jnp.ones((1,), jnp.float32)

    # Fold BN running stats into scale/shift (eval-mode semantics)
    s1 = gamma1 / jnp.sqrt(rvar1 + eps)
    t1 = beta1 - rmean1 * s1
    s2 = gamma2 / jnp.sqrt(rvar2 + eps)
    t2 = beta2 - rmean2 * s2

    scal = jnp.array([b2[0], s2[0], t2[0]], jnp.float32)  # [conv2 bias, BN2 scale, BN2 shift]
    return (
        s1.reshape(C, 1), t1.reshape(C, 1),
        w1,                       # (out, in) for channels-first w1 @ x
        b1.reshape(C, 1),
        w2.reshape(C, 1),         # (in, 1) column for VPU reduce
        scal,
    )


def reference(x_nchw, params):
    s1, t1, w1, b1, w2, scal = params
    N, C, H, W = x_nchw.shape
    # Mirror the kernel's bf16 input stream, f32 compute.
    xc = x_nchw.astype(jnp.bfloat16).astype(jnp.float32).reshape(N, C, H * W)
    h = xc * s1 + t1
    h = jnp.maximum(jnp.einsum('oc,ncm->nom', w1, h) + b1, 0.0)
    g = jnp.sum(w2[None] * h, axis=1, keepdims=True) + scal[0]
    g = g * scal[1] + scal[2]
    g = 1.0 / (1.0 + jnp.exp(-g))
    return g.reshape(N, 1, H, W)


if __name__ == "__main__":
    key = jax.random.PRNGKey(0)
    kx, kp = jax.random.split(key)

    N, C, H, W = 2, 4, 16, 16
    x = jax.random.normal(kx, (N, C, H, W), jnp.float32)
    params = make_params(kp, C)

    out = gated_conv(x, params)
    out = jax.block_until_ready(out)

    ref = reference(x, params)
    assert out.shape == (N, 1, H, W), out.shape
    assert jnp.allclose(out, ref, atol=2e-3, rtol=2e-3), \
        float(jnp.max(jnp.abs(out - ref)))

    print("KERNEL_OK")
</pallas_src>

<mosaic_0001>
module attributes {stable_mosaic.version = 11 : i64} {
  func.func @gated_conv_kernel(%arg0: i32, %arg1: i32, %arg2: memref<1x4x256xbf16, #tpu.memory_space<vmem>>, %arg3: memref<4x1xf32, #tpu.memory_space<vmem>>, %arg4: memref<4x1xf32, #tpu.memory_space<vmem>>, %arg5: memref<4x4xf32, #tpu.memory_space<vmem>>, %arg6: memref<4x1xf32, #tpu.memory_space<vmem>>, %arg7: memref<4x1xf32, #tpu.memory_space<vmem>>, %arg8: memref<3xf32, #tpu.memory_space<smem>>, %arg9: memref<1x1x256xf32, #tpu.memory_space<vmem>>) attributes {dimension_semantics = [#tpu.dimension_semantics<parallel>, #tpu.dimension_semantics<parallel>], iteration_bounds = array<i64: 2, 1>, scalar_prefetch = 0 : i64, scratch_operands = 0 : i64, tpu.core_type = #tpu.core_type<tc>, window_params = [{transform_indices = @transform_0, window_bounds = array<i64: 1, 4, 256>}, {pipeline_mode = #tpu.pipeline_mode<synchronous>, transform_indices = @transform_1, window_bounds = array<i64: 4, 1>}, {pipeline_mode = #tpu.pipeline_mode<synchronous>, transform_indices = @transform_2, window_bounds = array<i64: 4, 1>}, {pipeline_mode = #tpu.pipeline_mode<synchronous>, transform_indices = @transform_3, window_bounds = array<i64: 4, 4>}, {pipeline_mode = #tpu.pipeline_mode<synchronous>, transform_indices = @transform_4, window_bounds = array<i64: 4, 1>}, {pipeline_mode = #tpu.pipeline_mode<synchronous>, transform_indices = @transform_5, window_bounds = array<i64: 4, 1>}, {transform_indices = @transform_6, window_bounds = array<i64: 3>}, {transform_indices = @transform_7, window_bounds = array<i64: 1, 1, 256>}]} {
    %c0 = arith.constant 0 : index
    %c0_0 = arith.constant 0 : index
    %c0_1 = arith.constant 0 : index
    %0 = vector.load %arg2[%c0, %c0_0, %c0_1] : memref<1x4x256xbf16, #tpu.memory_space<vmem>>, vector<1x4x256xbf16>
    %1 = vector.shape_cast %0 : vector<1x4x256xbf16> to vector<4x256xbf16>
    %2 = arith.extf %1 : vector<4x256xbf16> to vector<4x256xf32>
    %c0_2 = arith.constant 0 : index
    %c0_3 = arith.constant 0 : index
    %3 = vector.load %arg3[%c0_2, %c0_3] : memref<4x1xf32, #tpu.memory_space<vmem>>, vector<4x1xf32>
    %4 = vector.broadcast %3 : vector<4x1xf32> to vector<4x256xf32>
    %5 = arith.mulf %2, %4 : vector<4x256xf32>
    %c0_4 = arith.constant 0 : index
    %c0_5 = arith.constant 0 : index
    %6 = vector.load %arg4[%c0_4, %c0_5] : memref<4x1xf32, #tpu.memory_space<vmem>>, vector<4x1xf32>
    %7 = vector.broadcast %6 : vector<4x1xf32> to vector<4x256xf32>
    %8 = arith.addf %5, %7 : vector<4x256xf32>
    %c0_6 = arith.constant 0 : index
    %c0_7 = arith.constant 0 : index
    %9 = vector.load %arg5[%c0_6, %c0_7] : memref<4x4xf32, #tpu.memory_space<vmem>>, vector<4x4xf32>
    %cst = arith.constant dense<0.000000e+00> : vector<4x256xf32>
    %10 = tpu.matmul %9, %8, %cst {dimension_numbers = #tpu.dot_dimension_numbers<[1], [0], [0], [1], [0, 0, 1, 1], [], []>} : vector<4x4xf32>, vector<4x256xf32>, vector<4x256xf32> -> vector<4x256xf32>
    %c0_8 = arith.constant 0 : index
    %c0_9 = arith.constant 0 : index
    %11 = vector.load %arg6[%c0_8, %c0_9] : memref<4x1xf32, #tpu.memory_space<vmem>>, vector<4x1xf32>
    %12 = vector.broadcast %11 : vector<4x1xf32> to vector<4x256xf32>
    %13 = arith.addf %10, %12 : vector<4x256xf32>
    %cst_10 = arith.constant 0.000000e+00 : f32
    %14 = vector.broadcast %cst_10 : f32 to vector<4x256xf32>
    %15 = arith.maximumf %13, %14 : vector<4x256xf32>
    %c0_11 = arith.constant 0 : index
    %c0_12 = arith.constant 0 : index
    %16 = vector.load %arg7[%c0_11, %c0_12] : memref<4x1xf32, #tpu.memory_space<vmem>>, vector<4x1xf32>
    %17 = vector.broadcast %16 : vector<4x1xf32> to vector<4x256xf32>
    %18 = arith.mulf %17, %15 : vector<4x256xf32>
    %cst_13 = arith.constant dense<0.000000e+00> : vector<256xf32>
    %19 = vector.multi_reduction <add>, %18, %cst_13 [0] : vector<4x256xf32> to vector<256xf32>
    %20 = vector.shape_cast %19 : vector<256xf32> to vector<1x256xf32>
    %c0_14 = arith.constant 0 : index
    %21 = memref.load %arg8[%c0_14] : memref<3xf32, #tpu.memory_space<smem>>
    %22 = vector.broadcast %21 : f32 to vector<1x256xf32>
    %23 = arith.addf %20, %22 : vector<1x256xf32>
    %c1 = arith.constant 1 : index
    %24 = memref.load %arg8[%c1] : memref<3xf32, #tpu.memory_space<smem>>
    %25 = vector.broadcast %24 : f32 to vector<1x256xf32>
    %26 = arith.mulf %23, %25 : vector<1x256xf32>
    %c2 = arith.constant 2 : index
    %27 = memref.load %arg8[%c2] : memref<3xf32, #tpu.memory_space<smem>>
    %28 = vector.broadcast %27 : f32 to vector<1x256xf32>
    %29 = arith.addf %26, %28 : vector<1x256xf32>
    %cst_15 = arith.constant 0.000000e+00 : f32
    %30 = vector.broadcast %cst_15 : f32 to vector<1x256xf32>
    %31 = arith.subf %30, %29 : vector<1x256xf32>
    %32 = math.exp %31 : vector<1x256xf32>
    %cst_16 = arith.constant 1.000000e+00 : f32
    %33 = vector.broadcast %cst_16 : f32 to vector<1x256xf32>
    %34 = arith.addf %33, %32 : vector<1x256xf32>
    %35 = tpu.reciprocal %34 {approx = true} : vector<1x256xf32> -> vector<1x256xf32>
    %c0_17 = arith.constant 0 : index
    %c0_18 = arith.constant 0 : index
    %c0_19 = arith.constant 0 : index
    %36 = vector.load %arg9[%c0_17, %c0_18, %c0_19] : memref<1x1x256xf32, #tpu.memory_space<vmem>>, vector<1x1x256xf32>
    %37 = vector.shape_cast %36 : vector<1x1x256xf32> to vector<1x256xf32>
    %38 = vector.shape_cast %35 : vector<1x256xf32> to vector<1x1x256xf32>
    tpu.vector_store %arg9[%c0_17, %c0_18, %c0_19], %38 {strides = array<i32>} : memref<1x1x256xf32, #tpu.memory_space<vmem>>, vector<1x1x256xf32>,
    return
  }
  func.func @transform_0(%arg0: i32, %arg1: i32) -> (i32, i32, i32) {
    %c0_i32 = arith.constant 0 : i32
    %c0_i32_0 = arith.constant 0 : i32
    return %arg0, %c0_i32, %arg1 : i32, i32, i32
  }
  func.func @transform_1(%arg0: i32, %arg1: i32) -> (i32, i32) {
    %c0_i32 = arith.constant 0 : i32
    %c0_i32_0 = arith.constant 0 : i32
    %c0_i32_1 = arith.constant 0 : i32
    return %c0_i32, %c0_i32_0 : i32, i32
  }
  func.func @transform_2(%arg0: i32, %arg1: i32) -> (i32, i32) {
    %c0_i32 = arith.constant 0 : i32
    %c0_i32_0 = arith.constant 0 : i32
    %c0_i32_1 = arith.constant 0 : i32
    return %c0_i32, %c0_i32_0 : i32, i32
  }
  func.func @transform_3(%arg0: i32, %arg1: i32) -> (i32, i32) {
    %c0_i32 = arith.constant 0 : i32
    %c0_i32_0 = arith.constant 0 : i32
    %c0_i32_1 = arith.constant 0 : i32
    return %c0_i32, %c0_i32_0 : i32, i32
  }
  func.func @transform_4(%arg0: i32, %arg1: i32) -> (i32, i32) {
    %c0_i32 = arith.constant 0 : i32
    %c0_i32_0 = arith.constant 0 : i32
    %c0_i32_1 = arith.constant 0 : i32
    return %c0_i32, %c0_i32_0 : i32, i32
  }
  func.func @transform_5(%arg0: i32, %arg1: i32) -> (i32, i32) {
    %c0_i32 = arith.constant 0 : i32
    %c0_i32_0 = arith.constant 0 : i32
    %c0_i32_1 = arith.constant 0 : i32
    return %c0_i32, %c0_i32_0 : i32, i32
  }
  func.func @transform_6(%arg0: i32, %arg1: i32) -> i32 {
    %c0_i32 = arith.constant 0 : i32
    %c0_i32_0 = arith.constant 0 : i32
    return %c0_i32 : i32
  }
  func.func @transform_7(%arg0: i32, %arg1: i32) -> (i32, i32, i32) {
    %c0_i32 = arith.constant 0 : i32
    %c0_i32_0 = arith.constant 0 : i32
    return %arg0, %c0_i32, %arg1 : i32, i32, i32
  }
}

</mosaic_0001>

<bundles_post_ra>
// kernel: tpu_custom_call.1
= control target key start
LH: loop header
LB: loop body
LE: loop exit
PB: predicated region body
PF: predicated region fallthrough
CT: control target
= control target key end

     0   :  { %12 = vsyncpa [#allocation4], 0  ;;  %s1005_s0 = inlined_call_operand.vmem [shape: bf16[2,4,256], index: 0, kind: input, shape index: {}]   ;;  %s1006_s1 = inlined_call_operand.vmem [shape: f32[4,1], index: 1, kind: input, shape index: {}]   ;;  %s1007_s2 = inlined_call_operand.vmem [shape: f32[4,1], index: 2, kind: input, shape index: {}]   ;;  %s1008_s3 = inlined_call_operand.vmem [shape: f32[4,4], index: 3, kind: input, shape index: {}]   ;;  %s1009_s4 = inlined_call_operand.vmem [shape: f32[4,1], index: 4, kind: input, shape index: {}]   ;;  %s1010_s5 = inlined_call_operand.vmem [shape: f32[4,1], index: 5, kind: input, shape index: {}]   ;;  %s1011_s6 = inlined_call_operand.vmem [shape: f32[3], index: 6, kind: input, shape index: {}]   ;;  %s1012_s7 = inlined_call_operand.hbm [shape: f32[2,1,256], index: 7, kind: output, shape index: {}]  }
   0x1   :  { %13 = vsyncpa [#allocation3], 0 }
   0x2   :  { %15 = vsyncpa [#allocation3 + $0x1], 0  ;;  %s860_s24 = smov 0   ;;  %s862_s25 = smov 0  }
   0x3   :  { %s864_s26 = smov 0   ;;  %s866_s27 = smov 0  }
   0x4   :  { %s868_s28 = smov 0   ;;  %s870_s29 = smov 0  }
   0x5 LB: > { %s615_s30 = sadd.s32 4294967295, %s812_s29   ;;  %s616_s8 = sadd.s32 4294967294, %s812_s29   ;;  %s812_s29 = sphi %s870_s29, %s21_s29   ;;  %s808_s28 = sphi %s868_s28, %s1021_s28   ;;  %s804_s27 = sphi %s866_s27, %s1020_s27   ;;  %s800_s26 = sphi %s864_s26, %s1019_s26   ;;  %s796_s25 = sphi %s862_s25, %s1018_s25   ;;  %s792_s24 = sphi %s860_s24, %s1017_s24  }
   0x6   : > { %s33_s9 = sadd.s32 1, %s808_s28  ;;  %s196_s10 = sadd.s32 1, %s800_s26 }
   0x7   : > { %p35_p0 = scmp.ge.s32.totalorder %s33_s9, 2  ;;  %p206_p1 = scmp.ne.s32.totalorder %s800_s26, %s796_s25 }
   0x8   : > { %p207_p2 = scmp.eq.s32.totalorder %s615_s30, 1  ;;  %p212_p3 = scmp.ne.s32.totalorder %s796_s25, %s792_s24 }
   0x9   : > { %s1023_s9 = smov (%p35_p0, %s33_s9), 0  ;;  %p213_p5 = scmp.eq.s32.totalorder %s616_s8, 1 }
   0xa   : > { %p900_p4 = por %p207_p2, %p206_p1  ;;  %s191_s12 = ssub.s32 %s808_s28, %s1023_s9 }
   0xb   : > { %p617_p6 = scmp.ge.s32.totalorder %s812_s29, 1  ;;  %p194_p7 = scmp.eq.s32.totalorder %s191_s12, 0 }
   0xc   : > { %p907_p8 = por %p213_p5, %p212_p3  ;;  %p220_p9 = scmp.lt.s32.totalorder %s812_s29, 3 }
   0xd   : > { %s913_s14 = scalar_select %p194_p7, %s800_s26, %s196_s10  }
   0xe   : > { %p915_p10 = pnand %p617_p6, %p220_p9  ;;  %p919_p11 = scmp.eq.s32.totalorder %s615_s30, 0 }
   0xf   : > { %s248_s19 = sshll.u32 %s1011_s6, 4  ;;  %s249_s19 = int_to_ptr.vmem [resolvable:$true] %s248_s19 }
  0x10   : > { %p643_p12 = pneg %p915_p10  ;;  %s717_s20 = scalar_lea.vmem %s249_s19, 16 }
  0x11   : > { %p718_p0 = scmp.ne.s32.totalorder %s249_s19, %s717_s20  ;;  %p725_p5 = scmp.lt.s32.totalorder %s249_s19, %s249_s19 }
  0x12   : > { %p644_p13 = pnand %p919_p11, %p643_p12  ;;  %p726_p6 = scmp.lt.s32.totalorder %s717_s20, %s717_s20 }
  0x14   : > { %p719_p1 = pneg %p644_p13  ;;  %p727_p7 = por %p726_p6, %p725_p5 }
  0x16   : > { %p720_p2 = pnand %p719_p1, %p718_p0 }
  0x18   : > { %p721_p3 = pneg %p720_p2 }
  0x1a   : > { %p728_p9 = pnand %p727_p7, %p721_p3 }
  0x1c   : > { %731 = shalt.err (!%p728_p9)
}
  0x1d   : > { %s814_s21 = smov [#allocation2]   ;;  %274 = sbr.rel (%p915_p10) target bundleno = 448 (0x1c0), region = 48 }
  0x1e   : > { %646 = dma.vmem_to_smem (!%p644_p13), %s249_s19, 16, %s814_s21, [#allocation4]  }
  0x22   : > { %783 = dma.done.wait (%p919_p11), [#allocation4], 16  }
  0x23   : > { %785 = vsyncadd (%p919_p11), [#allocation4], 4294967280 }
  0x24   : > { %280 = sfence }
  0x25   : > { %v324_v0 = vld [vmem:[%s1006_s1] sm:$0xf]  ;;  %v815_v1 = vmov 0   ;;  %v816_v3 = vmov 0.0   ;;  %p312_p10 = scmp.lt.s32.totalorder %s804_s27, 1  ;;  %v332_v8 = vlaneseq  ;;  %vm365_vm0 = vcmask 1043456  }
  0x26   : > { %707 = vset.pattern.permute.xlu0 %v815_v1  ;;  %708 = vset.pattern.permute.xlu1 %v815_v1  ;;  %v338_v2 = vld [vmem:[%s1007_s2] sm:$0xf]  ;;  %v817_v6 = vmov 839922192   ;;  %vm361_vm1 = vcmask 31744   ;;  %s465_s30 = sld [smem:[#allocation2]] }
  0x27   : > { %327 = vperm.xlu0 %707, %v324_v0   ;;  %434 = vmatprep.mubr.f32.mxu0 %v816_v3  ;;  %v353_v4 = vld [vmem:[%s1009_s4] sm:$0xf]  ;;  %s313_s17 = scalar_select %p312_p10, %s804_s27, 1  ;;  %v330_v7 = vunpack.c.l.s4 %v817_v6  ;;  %v951_v10 = vshrl.u32 %v332_v8, 7  ;;  %v818_v63 = vmov 1966171168  }
  0x28   : > { %356 = vperm.xlu1 %708, %v353_v4   ;;  %v443_v5 = vld [vmem:[%s1010_s5] sm:$0xf]  ;;  %s628_s8 = sld [smem:[#allocation2 + $0x1]]  ;;  %v491_v0 = vunpack.c.l.s4 %v818_v63  ;;  %s308_s12 = sand.u32 1, %s796_s25   ;;  %vm507_vm2 = vcmp.lt.s32.totalorder %v332_v8, 256 }
  0x29   : > { %s635_s18 = sshll.u32 %s313_s17, 2  ;;  %v331_v9 = vunpack.c.0.s8 %v330_v7  ;;  %v352_v21 = vld [vmem:[%s1008_s3] sm:$0xf]  ;;  %s629_s10 = sld [smem:[#allocation2 + $0x2]] }
  0x2a   : > { %s319_s21 = scalar_lea.vmem %s1005_s0, %s635_s18  ;;  %v492_v1 = vunpack.c.0.s8 %v491_v0  ;;  %s622_s15 = sshll.u32 %s308_s12, 1 }
  0x2b   : > { %341 = vperm.xlu0 %707, %v338_v2   ;;  %v334_v11 = vsub.s32 %v331_v9, %v951_v10  ;;  %v322_v12 = vld [vmem:[%s319_s21] sm:$0xf]  ;;  %s636_s16 = sshll.u32 %s804_s27, 5  ;;  %s310_s17 = scalar_lea.vmem [#allocation5], %s622_s15 }
  0x2c   : > { %446 = vperm.xlu1 %708, %v443_v5   ;;  %v323_v14 = vunpack.c.l.bf16 %v322_v12  ;;  %v466_v43 = vstv %s465_s30  ;;  %v495_v3 = vsub.s32 %v492_v1, %v951_v10  ;;  %s527_s18 = sshll.u32 %s310_s17, 4  ;;  %s525_s21 = scalar_lea.hbm %s1012_s7, %s636_s16  ;;  %s528_s18 = int_to_ptr.vmem [resolvable:$true] %s527_s18 }
  0x2d   : > { %s511_s22 = scalar_lea.sflag [#allocation3], %s308_s12  ;;  %s732_s23 = scalar_lea.vmem %s528_s18, 32 }
  0x2e   : > { %v470_v46 = vstv %s628_s8  ;;  %p733_p11 = scmp.ne.s32.totalorder %s528_s18, %s732_s23  ;;  %s819_s30 = smov [#allocation5]  }
  0x2f   : > { %v474_v49 = vstv %s629_s10  ;;  %s736_s27 = sshll.u32 %s819_s30, 4  ;;  %s737_s27 = int_to_ptr.vmem [resolvable:$false] %s736_s27 }
  0x30   : > { %p734_p12 = pnand %p733_p11, %p900_p4  ;;  %s738_s8 = scalar_lea.vmem %s737_s27, 64 }
  0x31   : > { %p739_p0 = scmp.lt.s32.totalorder %s528_s18, %s737_s27  ;;  %p740_p1 = scmp.lt.s32.totalorder %s738_s8, %s732_s23 }
  0x32   : > { %p735_p13 = pneg %p734_p12 }
  0x33   : > { %p741_p2 = por %p740_p1, %p739_p0 }
  0x35   : > { %p742_p3 = pnand %p741_p2, %p735_p13 }
  0xa2   : > { %v328_v13 = vpop.permute.xlu0 %327 }
  0xa3   : > { %v335_v15 = vrot.slane %v328_v13, %v334_v11  ;;  %v357_v22 = vpop.permute.xlu1 %356 }
  0xa5   : > { %v337_v17 = vmul.f32 %v335_v15, %v323_v14 }
  0xa6   : > { %v342_v16 = vpop.permute.xlu0 %341 }
  0xa7   : > { %v349_v18 = vrot.slane %v342_v16, %v334_v11  ;;  %v447_v28 = vpop.permute.xlu1 %446 }
  0xa9   : > { %v351_v19 = vadd.f32 %v349_v18, %v337_v17 }
  0xab   : > { %v360_v20 = vcombine.high %v351_v19, %v351_v19 }
  0xad   : > { %625 = vmatprep.subr.msk.mxu0 %vm365_vm0, %v360_v20 }
  0xae   : > { %626 = vmatpush1.msk.msra.mxu0 %vm365_vm0, %v351_v19 }
  0xaf   : > { %627 = vmatmul.mubr.msk.f32.vlgmr.msra.gmra.mxu0 %vm361_vm1, %v352_v21 }
 0x16f   : > { %v436_v23 = vpop.f32.mrf.mxu0 }
 0x170   : > { %v437_v24 = vadd.f32 %v436_v23, %v357_v22 }
 0x171   : > { %v438_v25 = vpop.f32.mrf.mxu0 }
 0x172   : > { %v441_v26 = vmax.f32 %v437_v24, 0.0  ;;  %v439_v27 = vadd.f32 %v438_v25, %v357_v22 }
 0x174   : > { %v449_v29 = vmul.f32 %v447_v28, %v441_v26  ;;  %v442_v30 = vmax.f32 %v439_v27, 0.0 }
 0x176   : > { %v451_v31 = vsel %vm365_vm0, %v449_v29, 0.0  ;;  %v450_v32 = vmul.f32 %v447_v28, %v442_v30 }
 0x177   : > { %v452_v33 = vrot.slane %v451_v31, 4 }
 0x178   : > { %v458_v34 = vsel %vm365_vm0, %v450_v32, 0.0 }
 0x179   : > { %v453_v35 = vadd.f32 %v452_v33, %v451_v31  ;;  %v459_v36 = vrot.slane %v458_v34, 4 }
 0x17b   : > { %v454_v37 = vrot.slane %v453_v35, 2  ;;  %v460_v38 = vadd.f32 %v459_v36, %v458_v34 }
 0x17d   : > { %v455_v39 = vadd.f32 %v454_v37, %v453_v35  ;;  %v461_v40 = vrot.slane %v460_v38, 2 }
 0x17f   : > { %v456_v41 = vrot.slane %v455_v39, 1  ;;  %v462_v42 = vadd.f32 %v461_v40, %v460_v38 }
 0x181   : > { %v457_v44 = vadd.f32 %v456_v41, %v455_v39  ;;  %v463_v45 = vrot.slane %v462_v42, 1 }
 0x183   : > { %v467_v47 = vadd.f32 %v466_v43, %v457_v44  ;;  %v464_v48 = vadd.f32 %v463_v45, %v462_v42 }
 0x185   : > { %v471_v50 = vmul.f32 %v470_v46, %v467_v47  ;;  %v468_v51 = vadd.f32 %v466_v43, %v464_v48 }
 0x187   : > { %v475_v52 = vadd.f32 %v474_v49, %v471_v50  ;;  %v472_v53 = vmul.f32 %v470_v46, %v468_v51 }
 0x189   : > { %v477_v54 = vsub.f32 0.0, %v475_v52  ;;  %v476_v55 = vadd.f32 %v474_v49, %v472_v53 }
 0x18b   : > { %v479_v56 = vmul.f32 1.442695, %v477_v54  ;;  %v478_v57 = vsub.f32 0.0, %v476_v55 }
 0x18d   : > { %709 = vpow2.f32 %v479_v56  ;;  %v481_v58 = vmul.f32 1.442695, %v478_v57 }
 0x18f   : > { %711 = vpow2.f32 %v481_v58 }
 0x19a   : > { %v710_v59 = vpop.eup %709 }
 0x19b   : > { %v483_v60 = vadd.f32 1.0, %v710_v59 }
 0x19c   : > { %v712_v61 = vpop.eup %711 }
 0x19d   : > { %v484_v62 = vadd.f32 1.0, %v712_v61  ;;  %713 = vrcp.f32 %v483_v60 }
 0x19f   : > { %715 = vrcp.f32 %v484_v62 }
 0x1aa   : > { %v714_v2 = vpop.eup %713 }
 0x1ac   : > { %v716_v4 = vpop.eup %715 }
 0x1ad   : > { %v489_v5 = vcombine.low %v714_v2, %v716_v4 }
 0x1af   : > { %v496_v6 = vrot.slane %v489_v5, %v495_v3 }
 0x1b1   : > { %v503_v7 = vrot.slane %v496_v6, %v495_v3 }
 0x1b3   : > { %509 = vst.msk [vmem:[%s310_s17] sm:$0x3] %vm507_vm2, %v503_v7 }
 0x1b4   : > { %745 = shalt.err (!%p742_p3)
}
 0x1b5   : > { %s746_s10 = scalar_lea.hbm %s525_s21, 32  ;;  %s750_s16 = scalar_lea.hbm %s1012_s7, 64 }
 0x1b6   : > { %p747_p5 = scmp.ne.s32.totalorder %s525_s21, %s746_s10  ;;  %p751_p9 = scmp.lt.s32.totalorder %s525_s21, %s1012_s7 }
 0x1b7   : > { %p752_p10 = scmp.lt.s32.totalorder %s750_s16, %s746_s10 }
 0x1b8   : > { %p748_p6 = pnand %p747_p5, %p900_p4 }
 0x1b9   : > { %p753_p11 = por %p752_p10, %p751_p9 }
 0x1ba   : > { %p749_p7 = pneg %p748_p6 }
 0x1bc   : > { %p754_p12 = pnand %p753_p11, %p749_p7 }
 0x1be   : > { %757 = shalt.err (!%p754_p12)
}
 0x1bf   : > { %641 = dma.vmem_to_hbm [thread:$0]  (%p900_p4), %s528_s18, 32, %s525_s21, %s511_s22  }
 0x1c0 PF: > { %p653_p13 = scmp.ge.s32.totalorder %s812_s29, 2  ;;  %s539_s20 = sand.u32 1, %s792_s24  }
 0x1c1   : > { %s540_s23 = scalar_lea.sflag [#allocation3], %s539_s20 }
 0x1c2   : > { %p648_p0 = pnand %p653_p13, %p907_p8 }
 0x1c4   : > { %p649_p1 = pneg %p648_p0 }
 0x1c6   : > { %787 = dma.done.wait (%p649_p1), %s540_s23, 32  }
 0x1c7   : > { %789 = vsyncadd (%p649_p1), %s540_s23, 4294967264  ;;  %s21_s29 = sadd.s32 1, %s812_s29   ;;  %s1017_s24 = smov %s796_s25 }
 0x1c8   : > { %p18_p2 = scmp.ge.s32.totalorder %s21_s29, 4   ;;  %s1018_s25 = smov %s800_s26 }
 0x1c9   : > { %s1019_s26 = smov %s913_s14  ;;  %s1020_s27 = smov %s808_s28 }
 0x1ca   : > { %s1021_s28 = smov %s1023_s9  ;;  %20 = sbr.rel (!%p18_p2) target bundleno = 5 (0x5), region = 88 }
 0x1cf   :  { %545 = vsyncpa [#allocation3], 1 }
 0x1d0   :  { %547 = vsyncpa [#allocation3 + $0x1], 1 }
 0x1d1   :  { %548 = vsyncpa [#allocation4], 1 }
 0x1d2   :  { %550 = vsyncpa [#allocation4 + $0x1], 1 }

</bundles_post_ra>
